<compile_context>
chip_gen: v6e
topology: v6e:2x2x1
jax: 0.10.0
libtpu: 0.0.40
codegen_flags: <defaults>
</compile_context>

<pallas_src>
import functools

import jax
import jax.numpy as jnp
from jax.experimental import pallas as pl
from jax.experimental.pallas import tpu as pltpu

_LANE = 128
_VMEM_LIMIT_BYTES = 48 * 1024 * 1024   # explicit scoped-VMEM limit (safe on all of v5e/v6e/v7x)
_VMEM_TILE_BUDGET = 40 * 1024 * 1024   # tile-sizing budget, headroom under the limit


def _mlp_kernel(x_ref, w1_ref, b1_ref, w2_ref, b2_ref, w3_ref, b3_ref, o_ref,
                *, x_is_transposed, out_is_transposed):
    # x_ref : (n_in, tb) if x_is_transposed else (tb, n_in)
    # w1_ref: (h1, n_in)      b1_ref: (h1, 1)
    # w2_ref: (h2, h1)        b2_ref: (h2, 1)
    # w3_ref: (h2, 1) when n_out == 1 (pre-transposed column), else (n_out, h2)
    # b3_ref: (n_out, 1)
    # o_ref : (n_out, tb) if out_is_transposed else (tb, n_out)
    if x_is_transposed:
        xT = x_ref[...]                      # (n_in, tb), batch on lanes
    else:
        xT = x_ref[...].T                    # small in-kernel XLU transpose (no HBM round-trip)

    # ---- layer 1:  h^T = W1 @ x^T + b1 ----
    if xT.shape[0] == 1:
        # K == n_in == 1: outer product -> VPU broadcast multiply, skip the MXU entirely.
        h = w1_ref[...] * xT + b1_ref[...]                               # (h1, tb)
    else:
        h = jnp.dot(w1_ref[...], xT,
                    preferred_element_type=jnp.float32) + b1_ref[...]
    h = jnp.maximum(h, 0.0)                  # ReLU (Dropout = identity in eval mode)

    # ---- layer 2:  MXU, M=h2, K=h1, N=tb (lane-dense); bf16 iff w2 stored bf16 ----
    h = jnp.dot(w2_ref[...], h.astype(w2_ref.dtype),
                preferred_element_type=jnp.float32) + b2_ref[...]        # (h2, tb)
    h = jnp.maximum(h, 0.0)                  # ReLU (Dropout = identity in eval mode)

    # ---- layer 3 ----
    if b3_ref.shape[0] == 1:
        # n_out == 1: per-column dot product -> VPU multiply + sublane reduce.
        y = jnp.sum(w3_ref[...] * h, axis=0, keepdims=True) + b3_ref[...]   # (1, tb)
    else:
        y = jnp.dot(w3_ref[...], h,
                    preferred_element_type=jnp.float32) + b3_ref[...]       # (n_out, tb)

    if out_is_transposed:
        o_ref[...] = y.astype(o_ref.dtype)   # lane-dense store
    else:
        o_ref[...] = y.T.astype(o_ref.dtype)


def _choose_tile(B, n_in, h1, h2, n_out):
    """Pick (tb, B_pad): batch tile sized by VMEM bytes, batch padded to a tile multiple."""
    # f32 bytes per batch element live in VMEM during one grid step:
    #   2x(h1+h2) for layer intermediates (2x safety factor for elementwise temporaries)
    #   + double-buffered input and output tiles.
    per_elem = 8 * (h1 + h2) + 2 * 4 * n_in + 2 * 4 * n_out
    weight_bytes = 4 * (h1 * n_in + h2 * h1 + n_out * h2 + h1 + h2 + n_out)
    avail = max(_VMEM_TILE_BUDGET - weight_bytes, per_elem * _LANE)
    tb_cap = max((avail // per_elem) // _LANE * _LANE, _LANE)

    B_pad = pl.cdiv(max(B, 1), _LANE) * _LANE            # lane-dense, unmasked stores
    tb = min(tb_cap, B_pad)
    if B_pad >= 2 * _LANE:
        # Guarantee >= 2 grid steps so ("parallel",) can shard across v7x's two TensorCores.
        tb = min(tb, (B_pad // 2) // _LANE * _LANE)
    tb = max(tb, _LANE)
    B_pad = pl.cdiv(B_pad, tb) * tb                      # pad the batch to a tile multiple
    return tb, B_pad


def mlp_forward(x, params, *, tb=None, use_bf16_matmul=None):
    """x: (B, n_in) float32. params: torch-layout weights (out, in), column biases (out, 1)."""
    x = jnp.asarray(x, jnp.float32)
    B, n_in = x.shape
    h1 = params["w1"].shape[0]
    h2 = params["w2"].shape[0]
    n_out = params["w3"].shape[0]

    if use_bf16_matmul is None:
        # bf16 on the MXU only pays once the h1 x h2 matmul is non-toy; the configs this
        # module is searched over (32..128) are launch/BW-bound, so keep exact f32 there.
        use_bf16_matmul = (h1 >= 256 and h2 >= 256)

    if tb is None:
        tb, B_pad = _choose_tile(B, n_in, h1, h2, n_out)
    else:
        assert tb % _LANE == 0, "batch tile must be a multiple of 128"
        B_pad = pl.cdiv(max(B, 1), tb) * tb

    # Zero-pad the batch so every tile is full: no masked partial stores, and the tile
    # choice is independent of B's divisibility (padded rows are computed and discarded).
    x_pad = x if B_pad == B else jnp.pad(x, ((0, B_pad - B), (0, 0)))

    w2 = params["w2"].astype(jnp.bfloat16) if use_bf16_matmul else params["w2"]
    w3 = params["w3"].T if n_out == 1 else params["w3"]   # (h2, 1) column for the VPU path

    x_is_transposed = (n_in == 1)     # (B,1) -> (1,B) is a free reshape in the wrapper
    out_is_transposed = (n_out == 1)  # keep the n_out==1 output lane-dense

    if x_is_transposed:
        x_arg = x_pad.reshape(1, B_pad)
        x_spec = pl.BlockSpec((1, tb), lambda i: (0, i))
    else:
        # Avoid an XLA HBM round-trip transpose: hand (tb, n_in) tiles to the kernel,
        # which transposes them on the XLU (overlaps with VPU/MXU work).
        x_arg = x_pad
        x_spec = pl.BlockSpec((tb, n_in), lambda i: (i, 0))

    if out_is_transposed:
        out_shape = jax.ShapeDtypeStruct((1, B_pad), jnp.float32)
        out_spec = pl.BlockSpec((1, tb), lambda i: (0, i))
    else:
        out_shape = jax.ShapeDtypeStruct((B_pad, n_out), jnp.float32)
        out_spec = pl.BlockSpec((tb, n_out), lambda i: (i, 0))

    # Weights / biases: resident in VMEM once, untiled -> not double-buffered per step.
    vmem_full = pl.BlockSpec(memory_space=pltpu.MemorySpace.VMEM)

    weight_bytes = 4 * (h1 * n_in + h1 + h2 * h1 + h2 + n_out * h2 + n_out)
    cost = pl.CostEstimate(
        flops=2 * B_pad * (n_in * h1 + h1 * h2 + h2 * n_out),
        transcendentals=0,
        bytes_accessed=4 * B_pad * (n_in + n_out) + weight_bytes,
    )

    kernel = functools.partial(_mlp_kernel,
                               x_is_transposed=x_is_transposed,
                               out_is_transposed=out_is_transposed)

    y = pl.pallas_call(
        kernel,
        out_shape=out_shape,
        grid=(B_pad // tb,),
        in_specs=[x_spec,
                  vmem_full, vmem_full,     # layer 1 params
                  vmem_full, vmem_full,     # layer 2 params
                  vmem_full, vmem_full],    # layer 3 params
        out_specs=out_spec,
        compiler_params=pltpu.CompilerParams(
            dimension_semantics=("parallel",),
            vmem_limit_bytes=_VMEM_LIMIT_BYTES,
        ),
        cost_estimate=cost,
    )(x_arg, params["w1"], params["b1"], w2, params["b2"], w3, params["b3"])

    if out_is_transposed:
        y = y.reshape(B_pad, 1)     # free reshape of a (1, B_pad) array
    return y[:B]


def init_params(key, n_in, n_hidden1, n_hidden2, n_out):
    """Deterministic init mimicking nn.Linear's U(-1/sqrt(fan_in), 1/sqrt(fan_in)).
    Weights stored in torch layout (out_features, in_features); biases as (out, 1)."""
    ks = jax.random.split(key, 6)

    def linear(kw, kb, fan_in, fan_out):
        bound = 1.0 / (fan_in ** 0.5)
        w = jax.random.uniform(kw, (fan_out, fan_in), jnp.float32, -bound, bound)
        b = jax.random.uniform(kb, (fan_out, 1), jnp.float32, -bound, bound)
        return w, b

    w1, b1 = linear(ks[0], ks[1], n_in, n_hidden1)
    w2, b2 = linear(ks[2], ks[3], n_hidden1, n_hidden2)
    w3, b3 = linear(ks[4], ks[5], n_hidden2, n_out)
    return {"w1": w1, "b1": b1, "w2": w2, "b2": b2, "w3": w3, "b3": b3}


if __name__ == "__main__":
    key = jax.random.PRNGKey(0)
    n_in, n_hidden1, n_hidden2, n_out = 1, 32, 32, 1
    batch = 64

    kx, kp = jax.random.split(key)
    x = jax.random.uniform(kx, (batch, n_in), jnp.float32, -5.0, 5.0)
    params = init_params(kp, n_in, n_hidden1, n_hidden2, n_out)

    y = mlp_forward(x, params)
    jax.block_until_ready(y)

    # sanity check against a pure-JAX reference of the same forward pass
    h1 = jnp.maximum(x @ params["w1"].T + params["b1"].T, 0.0)
    h2 = jnp.maximum(h1 @ params["w2"].T + params["b2"].T, 0.0)
    y_ref = h2 @ params["w3"].T + params["b3"].T
    assert y.shape == (batch, n_out)
    assert jnp.allclose(y, y_ref, atol=1e-4, rtol=1e-5), float(jnp.max(jnp.abs(y - y_ref)))

    print("KERNEL_OK")
</pallas_src>

<mosaic_0001>
module attributes {stable_mosaic.version = 11 : i64} {
  func.func @_mlp_kernel(%arg0: i32, %arg1: memref<1x128xf32, #tpu.memory_space<vmem>>, %arg2: memref<32x1xf32, #tpu.memory_space<vmem>>, %arg3: memref<32x1xf32, #tpu.memory_space<vmem>>, %arg4: memref<32x32xf32, #tpu.memory_space<vmem>>, %arg5: memref<32x1xf32, #tpu.memory_space<vmem>>, %arg6: memref<32x1xf32, #tpu.memory_space<vmem>>, %arg7: memref<1x1xf32, #tpu.memory_space<vmem>>, %arg8: memref<1x128xf32, #tpu.memory_space<vmem>>) attributes {dimension_semantics = [#tpu.dimension_semantics<parallel>], iteration_bounds = array<i64: 1>, scalar_prefetch = 0 : i64, scratch_operands = 0 : i64, tpu.core_type = #tpu.core_type<tc>, window_params = [{transform_indices = @transform_0, window_bounds = array<i64: 1, 128>}, {pipeline_mode = #tpu.pipeline_mode<synchronous>, transform_indices = @transform_1, window_bounds = array<i64: 32, 1>}, {pipeline_mode = #tpu.pipeline_mode<synchronous>, transform_indices = @transform_2, window_bounds = array<i64: 32, 1>}, {pipeline_mode = #tpu.pipeline_mode<synchronous>, transform_indices = @transform_3, window_bounds = array<i64: 32, 32>}, {pipeline_mode = #tpu.pipeline_mode<synchronous>, transform_indices = @transform_4, window_bounds = array<i64: 32, 1>}, {pipeline_mode = #tpu.pipeline_mode<synchronous>, transform_indices = @transform_5, window_bounds = array<i64: 32, 1>}, {pipeline_mode = #tpu.pipeline_mode<synchronous>, transform_indices = @transform_6, window_bounds = array<i64: 1, 1>}, {transform_indices = @transform_7, window_bounds = array<i64: 1, 128>}]} {
    %c0 = arith.constant 0 : index
    %c0_0 = arith.constant 0 : index
    %0 = vector.load %arg1[%c0, %c0_0] : memref<1x128xf32, #tpu.memory_space<vmem>>, vector<1x128xf32>
    %c0_1 = arith.constant 0 : index
    %c0_2 = arith.constant 0 : index
    %1 = vector.load %arg2[%c0_1, %c0_2] : memref<32x1xf32, #tpu.memory_space<vmem>>, vector<32x1xf32>
    %2 = vector.broadcast %1 : vector<32x1xf32> to vector<32x128xf32>
    %3 = vector.broadcast %0 : vector<1x128xf32> to vector<32x128xf32>
    %4 = arith.mulf %2, %3 : vector<32x128xf32>
    %c0_3 = arith.constant 0 : index
    %c0_4 = arith.constant 0 : index
    %5 = vector.load %arg3[%c0_3, %c0_4] : memref<32x1xf32, #tpu.memory_space<vmem>>, vector<32x1xf32>
    %6 = vector.broadcast %5 : vector<32x1xf32> to vector<32x128xf32>
    %7 = arith.addf %4, %6 : vector<32x128xf32>
    %cst = arith.constant 0.000000e+00 : f32
    %8 = vector.broadcast %cst : f32 to vector<32x128xf32>
    %9 = arith.maximumf %7, %8 : vector<32x128xf32>
    %c0_5 = arith.constant 0 : index
    %c0_6 = arith.constant 0 : index
    %10 = vector.load %arg4[%c0_5, %c0_6] : memref<32x32xf32, #tpu.memory_space<vmem>>, vector<32x32xf32>
    %cst_7 = arith.constant dense<0.000000e+00> : vector<32x128xf32>
    %11 = tpu.matmul %10, %9, %cst_7 {dimension_numbers = #tpu.dot_dimension_numbers<[1], [0], [0], [1], [0, 0, 1, 1], [], []>} : vector<32x32xf32>, vector<32x128xf32>, vector<32x128xf32> -> vector<32x128xf32>
    %c0_8 = arith.constant 0 : index
    %c0_9 = arith.constant 0 : index
    %12 = vector.load %arg5[%c0_8, %c0_9] : memref<32x1xf32, #tpu.memory_space<vmem>>, vector<32x1xf32>
    %13 = vector.broadcast %12 : vector<32x1xf32> to vector<32x128xf32>
    %14 = arith.addf %11, %13 : vector<32x128xf32>
    %cst_10 = arith.constant 0.000000e+00 : f32
    %15 = vector.broadcast %cst_10 : f32 to vector<32x128xf32>
    %16 = arith.maximumf %14, %15 : vector<32x128xf32>
    %c0_11 = arith.constant 0 : index
    %c0_12 = arith.constant 0 : index
    %17 = vector.load %arg6[%c0_11, %c0_12] : memref<32x1xf32, #tpu.memory_space<vmem>>, vector<32x1xf32>
    %18 = vector.broadcast %17 : vector<32x1xf32> to vector<32x128xf32>
    %19 = arith.mulf %18, %16 : vector<32x128xf32>
    %cst_13 = arith.constant dense<0.000000e+00> : vector<128xf32>
    %20 = vector.multi_reduction <add>, %19, %cst_13 [0] : vector<32x128xf32> to vector<128xf32>
    %21 = vector.shape_cast %20 : vector<128xf32> to vector<1x128xf32>
    %c0_14 = arith.constant 0 : index
    %c0_15 = arith.constant 0 : index
    %22 = vector.load %arg7[%c0_14, %c0_15] : memref<1x1xf32, #tpu.memory_space<vmem>>, vector<1x1xf32>
    %23 = vector.broadcast %22 : vector<1x1xf32> to vector<1x128xf32>
    %24 = arith.addf %21, %23 : vector<1x128xf32>
    %c0_16 = arith.constant 0 : index
    %c0_17 = arith.constant 0 : index
    %25 = vector.load %arg8[%c0_16, %c0_17] : memref<1x128xf32, #tpu.memory_space<vmem>>, vector<1x128xf32>
    tpu.vector_store %arg8[%c0_16, %c0_17], %24 {strides = array<i32>} : memref<1x128xf32, #tpu.memory_space<vmem>>, vector<1x128xf32>,
    return
  }
  func.func @transform_0(%arg0: i32) -> (i32, i32) {
    %c0_i32 = arith.constant 0 : i32
    %c0_i32_0 = arith.constant 0 : i32
    return %c0_i32, %arg0 : i32, i32
  }
  func.func @transform_1(%arg0: i32) -> (i32, i32) {
    %c0_i32 = arith.constant 0 : i32
    %c0_i32_0 = arith.constant 0 : i32
    %c0_i32_1 = arith.constant 0 : i32
    return %c0_i32, %c0_i32_0 : i32, i32
  }
  func.func @transform_2(%arg0: i32) -> (i32, i32) {
    %c0_i32 = arith.constant 0 : i32
    %c0_i32_0 = arith.constant 0 : i32
    %c0_i32_1 = arith.constant 0 : i32
    return %c0_i32, %c0_i32_0 : i32, i32
  }
  func.func @transform_3(%arg0: i32) -> (i32, i32) {
    %c0_i32 = arith.constant 0 : i32
    %c0_i32_0 = arith.constant 0 : i32
    %c0_i32_1 = arith.constant 0 : i32
    return %c0_i32, %c0_i32_0 : i32, i32
  }
  func.func @transform_4(%arg0: i32) -> (i32, i32) {
    %c0_i32 = arith.constant 0 : i32
    %c0_i32_0 = arith.constant 0 : i32
    %c0_i32_1 = arith.constant 0 : i32
    return %c0_i32, %c0_i32_0 : i32, i32
  }
  func.func @transform_5(%arg0: i32) -> (i32, i32) {
    %c0_i32 = arith.constant 0 : i32
    %c0_i32_0 = arith.constant 0 : i32
    %c0_i32_1 = arith.constant 0 : i32
    return %c0_i32, %c0_i32_0 : i32, i32
  }
  func.func @transform_6(%arg0: i32) -> (i32, i32) {
    %c0_i32 = arith.constant 0 : i32
    %c0_i32_0 = arith.constant 0 : i32
    %c0_i32_1 = arith.constant 0 : i32
    return %c0_i32, %c0_i32_0 : i32, i32
  }
  func.func @transform_7(%arg0: i32) -> (i32, i32) {
    %c0_i32 = arith.constant 0 : i32
    %c0_i32_0 = arith.constant 0 : i32
    return %c0_i32, %arg0 : i32, i32
  }
}

</mosaic_0001>

<bundles_post_ra>
// kernel: tpu_custom_call.1
= control target key start
LH: loop header
LB: loop body
LE: loop exit
PB: predicated region body
PF: predicated region fallthrough
CT: control target
= control target key end

     0   :  { %s465_s0 = inlined_call_operand.vmem [shape: f32[1,128], index: 0, kind: input, shape index: {}]   ;;  %s466_s1 = inlined_call_operand.vmem [shape: f32[32,1], index: 1, kind: input, shape index: {}]   ;;  %s467_s2 = inlined_call_operand.vmem [shape: f32[32,1], index: 2, kind: input, shape index: {}]   ;;  %s468_s3 = inlined_call_operand.vmem [shape: f32[32,32], index: 3, kind: input, shape index: {}]   ;;  %s469_s4 = inlined_call_operand.vmem [shape: f32[32,1], index: 4, kind: input, shape index: {}]   ;;  %s470_s5 = inlined_call_operand.vmem [shape: f32[32,1], index: 5, kind: input, shape index: {}]   ;;  %s471_s6 = inlined_call_operand.<no memory space> [shape: f32[1,1], index: 6, kind: input, shape index: {}]   ;;  %s472_s7 = inlined_call_operand.hbm [shape: f32[1,128], index: 7, kind: output, shape index: {}]  }
   0x1   :  { %v12_v0 = vstv %s471_s6 }
   0x2   :  { %13 = vst [vmem:[#allocation2] sm:$0x1] %v12_v0 }
   0x3   :  { %v67_v1 = vld [vmem:[%s467_s2 + $0x18] sm:$0xff]  ;;  %v350_v3 = vmov 0   ;;  %v32_v4 = vld [vmem:[%s466_s1 + $0x10] sm:$0xff]  ;;  %v31_v5 = vld [vmem:[%s466_s1 + $0x8] sm:$0xff] }
   0x4   :  { %v33_v2 = vld [vmem:[%s466_s1 + $0x18] sm:$0xff]  ;;  %327 = vset.pattern.permute.xlu1 %v350_v3  ;;  %326 = vset.pattern.permute.xlu0 %v350_v3 }
   0x5   :  { %85 = vperm.xlu1 %327, %v67_v1   ;;  %51 = vperm.xlu0 %326, %v33_v2  }
   0x9   :  { %46 = vperm.xlu0 %326, %v32_v4   ;;  %41 = vperm.xlu1 %327, %v31_v5  }
   0xa   :  { %14 = vsyncpa [#allocation4], 0  ;;  %v66_v6 = vld [vmem:[%s467_s2 + $0x10] sm:$0xff]  ;;  %v30_v7 = vld [vmem:[%s466_s1] sm:$0xff]  ;;  %vm124_vm0 = vcmask 261120  }
   0xb   :  { %v65_v8 = vld [vmem:[%s467_s2 + $0x8] sm:$0xff]  ;;  %v64_v9 = vld [vmem:[%s467_s2] sm:$0xff]  ;;  %v98_v13 = vld [vmem:[%s468_s3 + $0x10] sm:$0xff] }
   0xc   :  { %v100_v10 = vld [vmem:[%s469_s4] sm:$0xff]  ;;  %v101_v11 = vld [vmem:[%s469_s4 + $0x8] sm:$0xff]  ;;  %313 = vmatprep.mubr.msk.f32.mxu1 %vm124_vm0, %v98_v13  ;;  %v102_v14 = vld [vmem:[%s469_s4 + $0x10] sm:$0xff] }
   0xd   :  { %80 = vperm.xlu0 %326, %v66_v6   ;;  %36 = vperm.xlu1 %327, %v30_v7   ;;  %v96_v12 = vld [vmem:[%s468_s3] sm:$0xff]  ;;  %v103_v15 = vld [vmem:[%s469_s4 + $0x18] sm:$0xff]  ;;  %v227_v17 = vld [vmem:[%s470_s5 + $0x8] sm:$0xff]  ;;  %v269_v6 = vlaneseq }
   0xe   :  { %310 = vmatprep.mubr.msk.f32.mxu0 %vm124_vm0, %v96_v12  ;;  %v226_v16 = vld [vmem:[%s470_s5] sm:$0xff]  ;;  %v228_v18 = vld [vmem:[%s470_s5 + $0x10] sm:$0xff]  ;;  %v229_v19 = vld [vmem:[%s470_s5 + $0x18] sm:$0xff] }
   0xf   :  { %v263_v20 = vld [vmem:[#allocation2] sm:$0x1]  ;;  %v97_v42 = vld [vmem:[%s468_s3 + $0x8] sm:$0xff]  ;;  %v99_v43 = vld [vmem:[%s468_s3 + $0x18] sm:$0xff]  ;;  %s351_s3 = smov [#allocation3]  }
  0x10   :  { %v289_v21 = vld [vmem:[%s465_s0] ss:$0 sm:$0xff]  ;;  %s281_s15 = sshll.u32 %s351_s3, 4  ;;  %s282_s15 = int_to_ptr.vmem [resolvable:$true] %s281_s15 }
  0x11   :  { %75 = vperm.xlu0 %326, %v65_v8   ;;  %70 = vperm.xlu1 %327, %v64_v9   ;;  %v270_v9 = vshrl.u32 %v269_v6, 7  ;;  %s328_s16 = scalar_lea.vmem %s282_s15, 16  ;;  %s332_s17 = scalar_lea.vmem %s282_s15, 32 }
  0x12   :  { %p329_p0 = scmp.ne.s32.totalorder %s282_s15, %s328_s16  ;;  %p333_p1 = scmp.lt.s32.totalorder %s282_s15, %s282_s15 }
  0x13   :  { %v271_v12 = vsub.s32 0, %v270_v9  ;;  %p334_p2 = scmp.lt.s32.totalorder %s332_s17, %s328_s16 }
  0x15   :  { %106 = vperm.xlu0 %326, %v100_v10   ;;  %111 = vperm.xlu1 %327, %v101_v11   ;;  %p335_p3 = por %p334_p2, %p333_p1 }
  0x17   :  { %p336_p4 = pnand %p335_p3, %p329_p0 }
  0x19   :  { %116 = vperm.xlu0 %326, %v102_v14   ;;  %121 = vperm.xlu1 %327, %v103_v15  }
  0x1d   :  { %232 = vperm.xlu0 %326, %v226_v16   ;;  %237 = vperm.xlu1 %327, %v227_v17  }
  0x21   :  { %242 = vperm.xlu0 %326, %v228_v18   ;;  %247 = vperm.xlu1 %327, %v229_v19  }
  0x25   :  { %266 = vperm.xlu0 %326, %v263_v20  }
  0x80   :  { %v86_v22 = vpop.permute.xlu1 %85  ;;  %v52_v23 = vpop.permute.xlu0 %51 }
  0x81   :  { %v63_v24 = vmul.f32 %v289_v21, %v52_v23 }
  0x83   :  { %v91_v25 = vadd.f32 %v86_v22, %v63_v24 }
  0x84   :  { %v47_v26 = vpop.permute.xlu0 %46  ;;  %v42_v27 = vpop.permute.xlu1 %41 }
  0x85   :  { %v95_v28 = vmax.f32 %v91_v25, 0.0  ;;  %v62_v29 = vmul.f32 %v289_v21, %v47_v26  ;;  %v61_v33 = vmul.f32 %v289_v21, %v42_v27 }
  0x87   :  { %302 = vmatprep.subr.mxu0 %v95_v28  ;;  %316 = vmatprep.subr.mxu1 %v95_v28 }
  0x88   :  { %v81_v30 = vpop.permute.xlu0 %80  ;;  %v37_v31 = vpop.permute.xlu1 %36  ;;  %303 = vmatpush3.msra.mxu0 %v95_v28  ;;  %320 = vmatpush3.msra.mxu1 %v95_v28 }
  0x89   :  { %v90_v32 = vadd.f32 %v81_v30, %v62_v29  ;;  %v60_v35 = vmul.f32 %v289_v21, %v37_v31 }
  0x8b   :  { %v94_v34 = vmax.f32 %v90_v32, 0.0 }
  0x8c   :  { %v76_v36 = vpop.permute.xlu0 %75  ;;  %v71_v37 = vpop.permute.xlu1 %70 }
  0x8d   :  { %v89_v38 = vadd.f32 %v76_v36, %v61_v33  ;;  %v88_v39 = vadd.f32 %v71_v37, %v60_v35  ;;  %304 = vmatprep.subr.mxu0 %v94_v34  ;;  %317 = vmatprep.subr.mxu1 %v94_v34 }
  0x8e   :  { %305 = vmatpush3.msra.mxu0 %v94_v34  ;;  %321 = vmatpush3.msra.mxu1 %v94_v34 }
  0x8f   :  { %v93_v40 = vmax.f32 %v89_v38, 0.0  ;;  %v92_v41 = vmax.f32 %v88_v39, 0.0 }
  0x90   :  { %v107_v44 = vpop.permute.xlu0 %106  ;;  %v112_v45 = vpop.permute.xlu1 %111 }
  0x91   :  { %306 = vmatprep.subr.mxu0 %v93_v40  ;;  %318 = vmatprep.subr.mxu1 %v93_v40 }
  0x92   :  { %307 = vmatpush3.msra.mxu0 %v93_v40  ;;  %322 = vmatpush3.msra.mxu1 %v93_v40 }
  0x93   :  { %308 = vmatprep.subr.mxu0 %v92_v41  ;;  %319 = vmatprep.subr.mxu1 %v92_v41 }
  0x94   :  { %309 = vmatpush3.msra.mxu0 %v92_v41  ;;  %323 = vmatpush3.msra.mxu1 %v92_v41  ;;  %v117_v46 = vpop.permute.xlu0 %116  ;;  %v122_v47 = vpop.permute.xlu1 %121 }
  0x95   :  { %311 = vmatmul.mubr.msk.f32.vlgmr.msra.gmra.mxu0 %vm124_vm0, %v97_v42  ;;  %314 = vmatmul.mubr.msk.f32.vlgmr.msra.gmra.mxu1 %vm124_vm0, %v99_v43 }
  0x98   :  { %v233_v50 = vpop.permute.xlu0 %232  ;;  %v238_v58 = vpop.permute.xlu1 %237 }
  0x9c   :  { %v243_v0 = vpop.permute.xlu0 %242  ;;  %v248_v3 = vpop.permute.xlu1 %247 }
  0xa0   :  { %v267_v14 = vpop.permute.xlu0 %266 }
  0xa1   :  { %v272_v16 = vrot.slane %v267_v14, %v271_v12 }
 0x155   :  { %v312_v48 = vpop.f32.mrf.mxu0  ;;  %v315_v49 = vpop.f32.mrf.mxu1 }
 0x156   :  { %v209_v51 = vadd.f32 %v312_v48, %v112_v45  ;;  %v219_v55 = vadd.f32 %v315_v49, %v122_v47 }
 0x157   :  { %v203_v52 = vpop.f32.mrf.mxu0  ;;  %v213_v53 = vpop.f32.mrf.mxu1 }
 0x158   :  { %v223_v54 = vmax.f32 %v209_v51, 0.0  ;;  %v204_v56 = vadd.f32 %v203_v52, %v107_v44  ;;  %v214_v57 = vadd.f32 %v213_v53, %v117_v46  ;;  %v225_v62 = vmax.f32 %v219_v55, 0.0 }
 0x15a   :  { %v222_v59 = vmax.f32 %v204_v56, 0.0  ;;  %v224_v60 = vmax.f32 %v214_v57, 0.0  ;;  %v251_v61 = vmul.f32 %v238_v58, %v223_v54  ;;  %v253_v4 = vmul.f32 %v248_v3, %v225_v62 }
 0x15c   :  { %v250_v63 = vmul.f32 %v233_v50, %v222_v59  ;;  %v252_v2 = vmul.f32 %v243_v0, %v224_v60 }
 0x15e   :  { %v254_v1 = vadd.f32 %v251_v61, %v250_v63 }
 0x160   :  { %v255_v5 = vadd.f32 %v254_v1, %v252_v2 }
 0x162   :  { %v256_v7 = vadd.f32 %v255_v5, %v253_v4 }
 0x164   :  { %v257_v8 = vrot.slane %v256_v7, 4 }
 0x166   :  { %v258_v10 = vadd.f32 %v257_v8, %v256_v7 }
 0x168   :  { %v259_v11 = vrot.slane %v258_v10, 2 }
 0x16a   :  { %v260_v13 = vadd.f32 %v259_v11, %v258_v10 }
 0x16c   :  { %v261_v15 = vrot.slane %v260_v13, 1 }
 0x16e   :  { %v262_v17 = vadd.f32 %v261_v15, %v260_v13 }
 0x170   :  { %v273_v18 = vadd.f32 %v272_v16, %v262_v17 }
 0x172   :  { %274 = vst [vmem:[#allocation3] sm:$0x1] %v273_v18 }
 0x173   :  { %339 = shalt.err (!%p336_p4)
}
 0x174   :  { %284 = dma.vmem_to_hbm [thread:$0]  %s282_s15, 16, %s472_s7, [#allocation4]  }
 0x175   :  { %348 = dma.done.wait [#allocation4], 16  }
 0x176   :  { %349 = vsyncadd [#allocation4], 4294967280 }
 0x177   :  { %288 = vsyncpa [#allocation4], 1 }

</bundles_post_ra>
